<compile_context>
chip_gen: v7x
topology: tpu7x:2x2x1
jax: 0.10.0
libtpu: 0.0.40
codegen_flags: <defaults>
</compile_context>

<pallas_src>
import functools

import jax
import jax.numpy as jnp
from jax.experimental import pallas as pl
from jax.experimental.pallas import tpu as pltpu


def _round_up(x, m):
    return ((x + m - 1) // m) * m


def _vmem_limit(*byte_counts):
    """Scoped-VMEM limit: 2x (double-buffering) the listed per-block byte
    counts plus headroom, clamped below v7x physical VMEM."""
    return int(min(max(2 * sum(byte_counts) + (8 << 20), 16 << 20), 60 << 20))


def _pick_tile(n, cap):
    """Largest multiple-of-8 divisor of n (n a multiple of 8) that is <= cap."""
    t = min(cap, n)
    t -= t % 8
    while t >= 8:
        if n % t == 0:
            return t
        t -= 8
    return 8


# --------------------------------------------------------------------------
# Pallas kernels
# --------------------------------------------------------------------------
def _encoder_kernel(x_ref, w_ref, b_ref, wi_ref, bi_ref, f_ref, c_ref):
    # patchify-conv matmul + bias + ReLU, with the img_center head (Cf -> 1)
    # fused into the epilogue (feature tile never re-read from HBM).
    r = jnp.dot(x_ref[...], w_ref[...], preferred_element_type=jnp.float32)
    r = jnp.maximum(r + b_ref[...], 0.0)
    f_ref[...] = r.astype(f_ref.dtype)
    c_ref[...] = (jnp.dot(r.astype(jnp.bfloat16), wi_ref[...],
                          preferred_element_type=jnp.float32)
                  + bi_ref[...]).astype(c_ref.dtype)


def _warp_combine_kernel(g_ref, w_ref, o_ref, *, C):
    # g_ref: (1, 1, tyx, 4*C) gathered bilinear-corner features (bf16)
    # w_ref: (1, 1, tyx, 4)   f32 bilinear weights
    # o_ref: (1, tyx, C)      camera channel-slot of the BEV tensor
    g = g_ref[0, 0]
    w = w_ref[0, 0]
    acc = w[:, 0:1] * g[:, 0:C].astype(jnp.float32)
    for c in range(1, 4):
        acc = acc + w[:, c:c + 1] * g[:, c * C:(c + 1) * C].astype(jnp.float32)
    o_ref[0] = acc.astype(o_ref.dtype)


def _conv3x3_kernel(x_ref, w_ref, b_ref, o_ref, *, ty, P, X, act):
    # x_ref: (1, (Y+3)*P, Cin) zero-padded row-flattened NHWC slab (resident
    #        across the row-tile / channel-tile grid axes)
    # w_ref: (9, Cin, tco), b_ref: (1, tco), o_ref: (1, ty, X, tco)
    r = pl.program_id(1)
    tco = o_ref.shape[-1]
    Lr = ty * P
    base = pl.multiple_of(r * Lr, 8)
    acc = jnp.zeros((Lr, tco), jnp.float32)
    for ky in range(3):
        for kx in range(3):
            a = x_ref[0, pl.ds(base + ky * P + kx, Lr), :]
            acc = acc + jnp.dot(a, w_ref[ky * 3 + kx],
                                preferred_element_type=jnp.float32)
    acc = acc + b_ref[...]
    if act == "relu":
        acc = jnp.maximum(acc, 0.0)
    o_ref[0] = acc.reshape(ty, P, tco)[:, :X, :].astype(o_ref.dtype)


def _conv3x3_heads_kernel(x_ref, w_ref, b_ref, hw_ref, hb_ref, o_ref,
                          *, ty, P, X):
    # Decoder conv3x3 + ReLU with the fused (Cout -> n_heads) 1x1 head; only
    # the head result is stored (the decoder feature map never hits HBM).
    r = pl.program_id(1)
    Cout = w_ref.shape[-1]
    Lr = ty * P
    base = pl.multiple_of(r * Lr, 8)
    acc = jnp.zeros((Lr, Cout), jnp.float32)
    for ky in range(3):
        for kx in range(3):
            a = x_ref[0, pl.ds(base + ky * P + kx, Lr), :]
            acc = acc + jnp.dot(a, w_ref[ky * 3 + kx],
                                preferred_element_type=jnp.float32)
    acc = jnp.maximum(acc + b_ref[...], 0.0)
    d = acc.reshape(ty, P, Cout)[:, :X, :].reshape(ty * X, Cout)
    h = jnp.dot(d.astype(jnp.bfloat16), hw_ref[...],
                preferred_element_type=jnp.float32) + hb_ref[...]
    o_ref[0] = h.reshape(ty, X, -1).astype(o_ref.dtype)


def _in_relu_1x1_kernel(x_ref, w_ref, b_ref, o_ref, *, count):
    # Per-(sample, channel) spatial InstanceNorm (affine=False, eps=1e-5,
    # biased var, centered two-pass) + ReLU, fused with the 1x1 conv (C->Cout).
    x = x_ref[0].astype(jnp.float32)                    # (L, C)
    inv_n = 1.0 / count
    mean = jnp.sum(x, axis=0, keepdims=True) * inv_n
    xc = x - mean
    var = jnp.sum(xc * xc, axis=0, keepdims=True) * inv_n
    y = jnp.maximum(xc * jax.lax.rsqrt(var + 1e-5), 0.0)
    o_ref[0] = (jnp.dot(y.astype(jnp.bfloat16), w_ref[...],
                        preferred_element_type=jnp.float32)
                + b_ref[...]).astype(o_ref.dtype)


def _mm_kernel(x_ref, w_ref, b_ref, o_ref, *, act):
    # single-K-block matmul: no scratch accumulator / zero-init / copy.
    r = jnp.dot(x_ref[...], w_ref[...],
                preferred_element_type=jnp.float32) + b_ref[...]
    if act == "relu":
        r = jnp.maximum(r, 0.0)
    o_ref[...] = r.astype(o_ref.dtype)


# --------------------------------------------------------------------------
# Wrappers
# --------------------------------------------------------------------------
def matmul_bias_act(x, w, b, act="none", out_dtype=jnp.bfloat16, tm_cap=256):
    """x:(M,K) @ w:(K,N) + b, optional ReLU.  All matmuls in this model have
    K <= 512, so K is kept as a single block (no scratch accumulator)."""
    M, K = x.shape
    N = w.shape[1]
    tm = _pick_tile(_round_up(M, 8), tm_cap)
    Mp = _round_up(M, tm)
    xb = x.astype(jnp.bfloat16)
    if Mp > M:
        xb = jnp.pad(xb, ((0, Mp - M), (0, 0)))
    out = pl.pallas_call(
        functools.partial(_mm_kernel, act=act),
        out_shape=jax.ShapeDtypeStruct((Mp, N), out_dtype),
        grid=(Mp // tm,),
        in_specs=[pl.BlockSpec((tm, K), lambda i: (i, 0)),
                  pl.BlockSpec((K, N), lambda i: (0, 0)),
                  pl.BlockSpec((1, N), lambda i: (0, 0))],
        out_specs=pl.BlockSpec((tm, N), lambda i: (i, 0)),
        compiler_params=pltpu.CompilerParams(
            dimension_semantics=("parallel",),
            vmem_limit_bytes=_vmem_limit(tm * K * 2, K * N * 2, N * 4,
                                         tm * N * 4)),
    )(xb, w.astype(jnp.bfloat16), b.reshape(1, N).astype(jnp.float32))
    return out[:M]


def encoder_forward(rgb, enc_w, enc_b, imgc_w, imgc_b, mean, std, patch=4):
    """Simplified image encoder: non-overlapping patchify conv + ReLU with
    (x-mean)/std folded into the conv weights; img_center head fused into the
    matmul epilogue.  rgb:(N,3,H,W) -> feat (N,H/p,W/p,Cf) NHWC, imgc (N,H/p,W/p,1)."""
    # TODO(synk): Encoder_res18 (ResNet-18 + upsample head) is not reproduced;
    # a single strided patchify conv stands in for the 2D feature extractor.
    N, C, H, W = rgb.shape
    C2d = enc_w.shape[0]
    Hf, Wf = H // patch, W // patch
    wn = enc_w / std.reshape(1, C, 1, 1)
    bn = enc_b - jnp.sum(enc_w * (mean / std).reshape(1, C, 1, 1), axis=(1, 2, 3))
    # TODO(synk): this patchify rearrangement is a wrapper-side XLA pass; fold
    # it into the kernel DMA via an (Hf, Wf) index_map for production images.
    cols = (rgb.reshape(N, C, Hf, patch, Wf, patch)
               .transpose(0, 2, 4, 1, 3, 5)
               .reshape(N * Hf * Wf, C * patch * patch)).astype(jnp.bfloat16)
    M, K = cols.shape
    tm = _pick_tile(_round_up(M, 8), 512)
    Mp = _round_up(M, tm)
    if Mp > M:
        cols = jnp.pad(cols, ((0, Mp - M), (0, 0)))
    w2d = wn.reshape(C2d, K).T.astype(jnp.bfloat16)
    b2d = bn.reshape(1, C2d).astype(jnp.float32)
    wi = imgc_w.reshape(C2d, 1).astype(jnp.bfloat16)
    bi = imgc_b.reshape(1, 1).astype(jnp.float32)

    feat, imgc = pl.pallas_call(
        _encoder_kernel,
        out_shape=(jax.ShapeDtypeStruct((Mp, C2d), jnp.bfloat16),
                   jax.ShapeDtypeStruct((Mp, 1), jnp.float32)),
        grid=(Mp // tm,),
        in_specs=[
            pl.BlockSpec((tm, K), lambda i: (i, 0)),
            pl.BlockSpec((K, C2d), lambda i: (0, 0)),
            pl.BlockSpec((1, C2d), lambda i: (0, 0)),
            pl.BlockSpec((C2d, 1), lambda i: (0, 0)),
            pl.BlockSpec((1, 1), lambda i: (0, 0)),
        ],
        out_specs=(pl.BlockSpec((tm, C2d), lambda i: (i, 0)),
                   pl.BlockSpec((tm, 1), lambda i: (i, 0))),
        compiler_params=pltpu.CompilerParams(
            dimension_semantics=("parallel",),
            vmem_limit_bytes=_vmem_limit(tm * K * 2, K * C2d * 2, C2d * 4,
                                         C2d * 2, tm * C2d * 2, tm * 4,
                                         tm * C2d * 4)),
    )(cols, w2d, b2d, wi, bi)
    feat = feat[:M].reshape(N, Hf, Wf, C2d)
    imgc = imgc[:M].reshape(N, Hf, Wf, 1)
    return feat, imgc


def _bilinear_tables(Hinv, Hf, Wf, Y, X):
    """Per-BEV-cell bilinear sampling tables: 4 corner indices into the
    flattened (Hf*Wf) feature map and 4 f32 weights (zeros outside borders)."""
    ys, xs = jnp.meshgrid(jnp.arange(Y, dtype=jnp.float32),
                          jnp.arange(X, dtype=jnp.float32), indexing="ij")
    dst = jnp.stack([xs.ravel(), ys.ravel(),
                     jnp.ones(Y * X, jnp.float32)], axis=0)          # (3, YX)
    src = Hinv @ dst
    w = src[2]
    w = jnp.where(jnp.abs(w) < 1e-8, jnp.where(w < 0.0, -1e-8, 1e-8), w)
    u = src[0] / w
    v = src[1] / w
    x0 = jnp.floor(u)
    y0 = jnp.floor(v)
    dx = u - x0
    dy = v - y0
    idxs, wts = [], []
    # TODO(synk): exact kornia border/normalization corner cases not replicated.
    for ox, oy, wgt in ((0, 0, (1 - dx) * (1 - dy)), (1, 0, dx * (1 - dy)),
                        (0, 1, (1 - dx) * dy), (1, 1, dx * dy)):
        xi = x0 + ox
        yi = y0 + oy
        valid = (xi >= 0) & (xi < Wf) & (yi >= 0) & (yi < Hf)
        idx = jnp.clip(yi * Wf + xi, 0, Hf * Wf - 1).astype(jnp.int32)
        idxs.append(idx)
        wts.append(jnp.where(valid, wgt, 0.0))
    return jnp.stack(idxs, axis=-1), jnp.stack(wts, axis=-1)   # (YX,4) x2


def warp_perspective_nhwc(feat, proj_mats, out_hw, B, S):
    """kornia-style warp_perspective for every camera, fused with the
    per-camera channel concat: returns (B, Y*X, S*C) BEV features (bf16).
    feat:(B*S,Hf,Wf,C) NHWC, proj_mats:(B*S,3,3) featpix -> mem."""
    N, Hf, Wf, C = feat.shape
    Y, X = out_hw
    YX = Y * X
    Kw = Hf * Wf
    Hinv = jnp.linalg.inv(proj_mats)                     # mem(dst) -> featpix

    idx, wts = jax.vmap(lambda M: _bilinear_tables(M, Hf, Wf, Y, X))(Hinv)
    feat_flat = feat.reshape(N, Kw, C)
    # Row-gather of the 4 bilinear corners per BEV cell (replaces the dense
    # (YX, Hf*Wf) sampling matmul: ~Kw/4x fewer bytes and MXU flops).
    # TODO(synk): move this gather inside the Pallas kernel (dynamic-gather /
    # scalar-prefetch DMA) so the 4x gathered tensor is never materialized.
    gathered = jax.vmap(lambda f, i: f[i.reshape(-1)])(feat_flat, idx)
    gathered = gathered.reshape(N, YX, 4 * C)

    YXp = _round_up(YX, 8)
    tyx = _pick_tile(YXp, 512)
    if YXp > YX:
        gathered = jnp.pad(gathered, ((0, 0), (0, YXp - YX), (0, 0)))
        wts = jnp.pad(wts, ((0, 0), (0, YXp - YX), (0, 0)))
    gathered = gathered.reshape(B, S, YXp, 4 * C)
    wts = wts.reshape(B, S, YXp, 4).astype(jnp.float32)

    out = pl.pallas_call(
        functools.partial(_warp_combine_kernel, C=C),
        out_shape=jax.ShapeDtypeStruct((B, YXp, S * C), jnp.bfloat16),
        grid=(B, S, YXp // tyx),
        in_specs=[
            pl.BlockSpec((1, 1, tyx, 4 * C), lambda b, s, j: (b, s, j, 0)),
            pl.BlockSpec((1, 1, tyx, 4), lambda b, s, j: (b, s, j, 0)),
        ],
        out_specs=pl.BlockSpec((1, tyx, C), lambda b, s, j: (b, j, s)),
        compiler_params=pltpu.CompilerParams(
            dimension_semantics=("parallel", "parallel", "parallel"),
            vmem_limit_bytes=_vmem_limit(tyx * 4 * C * 2, tyx * 4 * 4,
                                         tyx * C * 2, tyx * C * 4)),
    )(gathered, wts)
    return out[:, :YX, :]


def conv2d_3x3_nhwc(x, w, b, act="none", out_dtype=jnp.bfloat16,
                    head_w=None, head_b=None):
    """3x3 conv, stride 1, pad 1, NHWC.  x:(B,Y,X,Cin), w:(Cout,Cin,3,3) torch
    layout, b:(Cout,).  If head_w:(Cout,NH)/head_b:(NH,) are given, a ReLU and
    a fused 1x1 head are applied and ONLY the head result (B,Y,X,NH) f32 is
    returned (the conv feature map never hits HBM)."""
    B, Y, X, Cin = x.shape
    Cout = w.shape[0]
    P = _round_up(X + 2, 8)     # sublane-aligned padded row pitch
    # single zero-pad pass: rows (1 top, 2 bottom), cols (1 left, P-X-1 right);
    # the 2 extra bottom rows keep all nine shifted row-window slices of the
    # flattened slab in bounds.
    g = jnp.pad(x.astype(jnp.bfloat16),
                ((0, 0), (1, 2), (1, P - X - 1), (0, 0)))
    g = g.reshape(B, (Y + 3) * P, Cin)
    w9 = jnp.transpose(w, (2, 3, 1, 0)).reshape(9, Cin, Cout).astype(jnp.bfloat16)
    b2 = b.reshape(1, Cout).astype(jnp.float32)

    # lane-dense output channel tiles (pad Cout up to a multiple of 128)
    Coutp = _round_up(Cout, 128)
    if Coutp > Cout:
        w9 = jnp.pad(w9, ((0, 0), (0, 0), (0, Coutp - Cout)))
        b2 = jnp.pad(b2, ((0, 0), (0, Coutp - Cout)))
    tco = 128
    nco = Coutp // tco

    # output row tiling: bounded accumulator + a >=2-extent parallel axis.
    # TODO(synk): for production BEV grids the input slab should also be row
    # tiled (halo DMA from HBM) instead of kept fully resident per batch.
    ty = Y
    for cand in range(min(Y // 2, 32), 0, -1):
        if Y % cand == 0:
            ty = cand
            break
    R = Y // ty

    rows = (Y + 3) * P
    x_bytes = rows * Cin * 2
    w_bytes = 9 * Cin * tco * 2
    acc_bytes = ty * P * tco * 4

    if head_w is not None:
        NH = head_w.shape[1]
        assert nco == 1, "fused head path needs a single output-channel tile"
        hw = head_w.astype(jnp.bfloat16)
        if Coutp > Cout:
            hw = jnp.pad(hw, ((0, Coutp - Cout), (0, 0)))
        hb = head_b.reshape(1, NH).astype(jnp.float32)
        return pl.pallas_call(
            functools.partial(_conv3x3_heads_kernel, ty=ty, P=P, X=X),
            out_shape=jax.ShapeDtypeStruct((B, Y, X, NH), jnp.float32),
            grid=(B, R, 1),
            in_specs=[
                pl.BlockSpec((1, rows, Cin), lambda b_, r_, c_: (b_, 0, 0)),
                pl.BlockSpec((9, Cin, tco), lambda b_, r_, c_: (0, 0, c_)),
                pl.BlockSpec((1, tco), lambda b_, r_, c_: (0, c_)),
                pl.BlockSpec((Coutp, NH), lambda b_, r_, c_: (0, 0)),
                pl.BlockSpec((1, NH), lambda b_, r_, c_: (0, 0)),
            ],
            out_specs=pl.BlockSpec((1, ty, X, NH),
                                   lambda b_, r_, c_: (b_, r_, 0, 0)),
            compiler_params=pltpu.CompilerParams(
                dimension_semantics=("parallel", "parallel", "parallel"),
                vmem_limit_bytes=_vmem_limit(x_bytes, w_bytes, tco * 4,
                                             Coutp * NH * 2, NH * 4,
                                             ty * X * NH * 4, acc_bytes)),
        )(g, w9, b2, hw, hb)

    out = pl.pallas_call(
        functools.partial(_conv3x3_kernel, ty=ty, P=P, X=X, act=act),
        out_shape=jax.ShapeDtypeStruct((B, Y, X, Coutp), out_dtype),
        grid=(B, R, nco),
        in_specs=[
            pl.BlockSpec((1, rows, Cin), lambda b_, r_, c_: (b_, 0, 0)),
            pl.BlockSpec((9, Cin, tco), lambda b_, r_, c_: (0, 0, c_)),
            pl.BlockSpec((1, tco), lambda b_, r_, c_: (0, c_)),
        ],
        out_specs=pl.BlockSpec((1, ty, X, tco),
                               lambda b_, r_, c_: (b_, r_, 0, c_)),
        compiler_params=pltpu.CompilerParams(
            dimension_semantics=("parallel", "parallel", "parallel"),
            vmem_limit_bytes=_vmem_limit(x_bytes, w_bytes, tco * 4,
                                         ty * X * tco * 2, acc_bytes)),
    )(g, w9, b2)
    if Coutp > Cout:
        out = out[..., :Cout]
    return out


def instnorm_relu_1x1_nhwc(x, w, b, out_dtype=jnp.bfloat16):
    """x:(B,Y,X,C) -> per-(B,C) spatial InstanceNorm + ReLU + 1x1 conv (C->Cout),
    all fused in one kernel (the normalized tensor never hits HBM)."""
    # TODO(synk): nn.InstanceNorm3d on a 4D tensor is ill-posed in recent torch;
    # per-(B, C) 2D spatial instance-norm semantics are used here.
    # TODO(synk): tile L = Y*X (two-pass stats across a grid axis) for production
    # BEV grids where the whole (L, C) tile does not fit the scoped VMEM limit.
    B, Y, X, C = x.shape
    Cout = w.shape[1]
    L = Y * X
    x2 = x.reshape(B, L, C)
    wb = w.astype(jnp.bfloat16)
    b2 = b.reshape(1, Cout).astype(jnp.float32)
    out = pl.pallas_call(
        functools.partial(_in_relu_1x1_kernel, count=float(L)),
        out_shape=jax.ShapeDtypeStruct((B, L, Cout), out_dtype),
        grid=(B,),
        in_specs=[
            pl.BlockSpec((1, L, C), lambda b_: (b_, 0, 0)),
            pl.BlockSpec((C, Cout), lambda b_: (0, 0)),
            pl.BlockSpec((1, Cout), lambda b_: (0, 0)),
        ],
        out_specs=pl.BlockSpec((1, L, Cout), lambda b_: (b_, 0, 0)),
        compiler_params=pltpu.CompilerParams(
            dimension_semantics=("arbitrary",),
            vmem_limit_bytes=_vmem_limit(L * C * 2, C * Cout * 2, Cout * 4,
                                         L * Cout * 2, L * C * 4)),
    )(x2, wb, b2)
    return out.reshape(B, Y, X, Cout)


# --------------------------------------------------------------------------
# Synthetic vox_util stand-in (the real one lives outside the module)
# --------------------------------------------------------------------------
class SimpleVoxUtil:
    # TODO(synk): original vox_util object not available; simple metric grid.
    def __init__(self, bounds=((-8.0, 8.0), (-8.0, 8.0), (-2.0, 2.0))):
        self.bounds = bounds

    def get_ref_T_mem(self, B, Y, Z, X):
        (x0, x1), (y0, y1), (z0, z1) = self.bounds
        dx = (x1 - x0) / X
        dy = (y1 - y0) / Y
        dz = (z1 - z0) / Z
        m = jnp.array([[dx, 0, 0, x0 + dx / 2],
                       [0, dy, 0, y0 + dy / 2],
                       [0, 0, dz, z0 + dz / 2],
                       [0, 0, 0, 1.0]], jnp.float32)
        return jnp.tile(m[None], (B, 1, 1))


# --------------------------------------------------------------------------
# MVDet parameters + forward
# --------------------------------------------------------------------------
def init_mvdet_params(key, S, feat2d_dim, latent_dim, patch=4):
    ks = jax.random.split(key, 20)
    n = lambda k, shp, s=0.05: (s * jax.random.normal(k, shp)).astype(jnp.float32)
    z = lambda shp: jnp.zeros(shp, jnp.float32)
    return {
        "enc_w": n(ks[0], (feat2d_dim, 3, patch, patch)),
        "enc_b": z((feat2d_dim,)),
        # world_feat (num_cameras branch): Conv3x3(S*feat2d->latent), IN, ReLU, Conv1x1
        "w1_w": n(ks[1], (latent_dim, S * feat2d_dim, 3, 3)),
        "w1_b": z((latent_dim,)),
        "w2_w": n(ks[2], (latent_dim, latent_dim)),
        "w2_b": z((latent_dim,)),
        # simplified decoder
        "dec_w": n(ks[3], (latent_dim, latent_dim, 3, 3)),
        "dec_b": z((latent_dim,)),
        "h_center_w": n(ks[4], (1, latent_dim)),  "h_center_b": z((1,)),
        "h_offset_w": n(ks[5], (2, latent_dim)),  "h_offset_b": z((2,)),
        "h_size_w":   n(ks[6], (2, latent_dim)),  "h_size_b":   z((2,)),
        "h_rot_w":    n(ks[7], (1, latent_dim)),  "h_rot_b":    z((1,)),
        "h_imgc_w":   n(ks[8], (1, feat2d_dim)),  "h_imgc_b":   z((1,)),
        # learned loss-weights from __init__ (unused in forward, kept for parity)
        "center_weight": jnp.float32(0.0),
        "offset_weight": jnp.float32(0.0),
        "size_weight": jnp.float32(0.0),
        "rot_weight": jnp.float32(0.0),
    }


def mvdet_forward(params, rgb_cams, pix_T_cams, cams_T_global, vox_util,
                  ref_T_global, Y, Z, X, feat2d_dim, latent_dim):
    """Forward pass of MVDet (num_cameras=S branch, rand_flip=False)."""
    B, S, C, H, W = rgb_cams.shape

    # __p pack_seqdim
    rgb_cams_ = rgb_cams.reshape(B * S, C, H, W)
    pix_T_cams_ = pix_T_cams.reshape(B * S, 4, 4)
    cams_T_global_ = cams_T_global.reshape(B * S, 4, 4)

    global_T_cams_ = jnp.linalg.inv(cams_T_global_)
    ref_T_cams_ = jnp.matmul(jnp.tile(ref_T_global, (S, 1, 1)), global_T_cams_)
    cams_T_ref_ = jnp.linalg.inv(ref_T_cams_)

    mean = jnp.array([0.485, 0.456, 0.406], jnp.float32)
    std = jnp.array([0.229, 0.224, 0.225], jnp.float32)

    # encoder (normalization folded into weights) + fused img_center head
    feat_cams, imgc = encoder_forward(rgb_cams_, params["enc_w"],
                                      params["enc_b"], params["h_imgc_w"],
                                      params["h_imgc_b"], mean, std)
    _, Hf, Wf, Cf = feat_cams.shape
    sy = Hf / float(H)
    sx = Wf / float(W)

    # scale_intrinsics
    scale = jnp.array([sx, sy, 1.0, 1.0], jnp.float32).reshape(1, 4, 1)
    featpix_T_cams_ = pix_T_cams_ * scale

    sel = jnp.array([0, 1, 3])
    featpix_T_ref_ = jnp.matmul(featpix_T_cams_[:, :3, :3],
                                cams_T_ref_[:, :3, :][:, :, sel])
    ref_T_mem = vox_util.get_ref_T_mem(B, Y, Z, X)
    ref_T_mem3 = ref_T_mem[0][sel][:, sel]
    featpix_T_mem_ = jnp.matmul(featpix_T_ref_, ref_T_mem3)
    proj_mats = jnp.linalg.inv(featpix_T_mem_)            # mem_T_featpix

    # warp_perspective (bilinear gather + Pallas weighted combine, fused with
    # the per-camera channel concat)
    bev = warp_perspective_nhwc(feat_cams, proj_mats, (Y, X), B, S)
    bev = bev.reshape(B, Y, X, S * Cf)

    # world_feat: Conv3x3 -> [InstanceNorm + ReLU + Conv1x1 fused]
    wf = conv2d_3x3_nhwc(bev, params["w1_w"], params["w1_b"], act="none")
    wf = instnorm_relu_1x1_nhwc(wf, params["w2_w"].T, params["w2_b"])

    # decoder (simplified): shared Conv3x3 + ReLU with the four BEV heads
    # fused into its epilogue (single latent->6 1x1).
    # TODO(synk): original Decoder architecture not provided; stand-in heads.
    head_w = jnp.concatenate([params["h_center_w"], params["h_offset_w"],
                              params["h_size_w"], params["h_rot_w"]], axis=0).T
    head_b = jnp.concatenate([params["h_center_b"], params["h_offset_b"],
                              params["h_size_b"], params["h_rot_b"]], axis=0)
    if latent_dim <= 128:
        heads = conv2d_3x3_nhwc(wf, params["dec_w"], params["dec_b"],
                                head_w=head_w, head_b=head_b)
    else:
        d = conv2d_3x3_nhwc(wf, params["dec_w"], params["dec_b"], act="relu")
        heads = matmul_bias_act(d.reshape(B * Y * X, latent_dim), head_w,
                                head_b, act="none",
                                out_dtype=jnp.float32).reshape(B, Y, X, 6)
    heads = heads.transpose(0, 3, 1, 2)                   # (B, 6, Y, X)
    img_center = imgc.transpose(0, 3, 1, 2)               # (B*S, 1, Hf, Wf)

    return {
        "instance_center": heads[:, 0:1],
        "instance_offset": heads[:, 1:3],
        "instance_size":   heads[:, 3:5],
        "instance_rot":    heads[:, 5:6],
        "img_center":      img_center,
    }


# --------------------------------------------------------------------------
if __name__ == "__main__":
    B, S, C, H, W = 1, 2, 3, 32, 32
    Y, Z, X = 16, 4, 16
    feat2d_dim, latent_dim = 128, 128   # feat2d_dim=128 matches the module

    key = jax.random.PRNGKey(0)
    k_img, k_par = jax.random.split(key)

    rgb_cams = jax.random.uniform(k_img, (B, S, C, H, W), jnp.float32)

    # intrinsics (4x4)
    f = 20.0
    pix = jnp.array([[f, 0.0, W / 2.0, 0.0],
                     [0.0, f, H / 2.0, 0.0],
                     [0.0, 0.0, 1.0, 0.0],
                     [0.0, 0.0, 0.0, 1.0]], jnp.float32)
    pix_T_cams = jnp.tile(pix[None, None], (B, S, 1, 1))

    # extrinsics: rotation about z + translation (invertible, well-conditioned)
    def cam_T_global(angle, t):
        c, s = jnp.cos(angle), jnp.sin(angle)
        R = jnp.array([[c, -s, 0.0], [s, c, 0.0], [0.0, 0.0, 1.0]], jnp.float32)
        M = jnp.eye(4, dtype=jnp.float32)
        M = M.at[:3, :3].set(R).at[:3, 3].set(jnp.asarray(t, jnp.float32))
        return M

    cams_T_global = jnp.stack(
        [cam_T_global(0.3, (0.5, -0.3, 3.0)),
         cam_T_global(-0.4, (-0.7, 0.4, 3.5))], axis=0)[None]   # (B, S, 4, 4)
    ref_T_global = jnp.tile(jnp.eye(4, dtype=jnp.float32)[None], (B, 1, 1))

    vox_util = SimpleVoxUtil()
    params = init_mvdet_params(k_par, S, feat2d_dim, latent_dim)

    out = mvdet_forward(params, rgb_cams, pix_T_cams, cams_T_global, vox_util,
                        ref_T_global, Y, Z, X, feat2d_dim, latent_dim)
    out = jax.tree_util.tree_map(jax.block_until_ready, out)

    assert out["instance_center"].shape == (B, 1, Y, X)
    assert out["instance_offset"].shape == (B, 2, Y, X)
    assert out["instance_size"].shape == (B, 2, Y, X)
    assert out["instance_rot"].shape == (B, 1, Y, X)
    assert out["img_center"].shape == (B * S, 1, H // 4, W // 4)
    for v in out.values():
        assert bool(jnp.all(jnp.isfinite(v)))
    print("KERNEL_OK")
</pallas_src>

<mosaic_0001>
module attributes {stable_mosaic.version = 11 : i64} {
  func.func @_encoder_kernel(%arg0: i32, %arg1: memref<128x48xbf16, #tpu.memory_space<vmem>>, %arg2: memref<48x128xbf16, #tpu.memory_space<vmem>>, %arg3: memref<1x128xf32, #tpu.memory_space<vmem>>, %arg4: memref<128x1xbf16, #tpu.memory_space<vmem>>, %arg5: memref<1x1xf32, #tpu.memory_space<vmem>>, %arg6: memref<128x128xbf16, #tpu.memory_space<vmem>>, %arg7: memref<128x1xf32, #tpu.memory_space<vmem>>) attributes {dimension_semantics = [#tpu.dimension_semantics<parallel>], iteration_bounds = array<i64: 1>, scalar_prefetch = 0 : i64, scratch_operands = 0 : i64, tpu.core_type = #tpu.core_type<tc>, window_params = [{transform_indices = @transform_0, window_bounds = array<i64: 128, 48>}, {pipeline_mode = #tpu.pipeline_mode<synchronous>, transform_indices = @transform_1, window_bounds = array<i64: 48, 128>}, {pipeline_mode = #tpu.pipeline_mode<synchronous>, transform_indices = @transform_2, window_bounds = array<i64: 1, 128>}, {pipeline_mode = #tpu.pipeline_mode<synchronous>, transform_indices = @transform_3, window_bounds = array<i64: 128, 1>}, {pipeline_mode = #tpu.pipeline_mode<synchronous>, transform_indices = @transform_4, window_bounds = array<i64: 1, 1>}, {transform_indices = @transform_5, window_bounds = array<i64: 128, 128>}, {transform_indices = @transform_6, window_bounds = array<i64: 128, 1>}]} {
    %c0 = arith.constant 0 : index
    %c0_0 = arith.constant 0 : index
    %0 = vector.load %arg1[%c0, %c0_0] : memref<128x48xbf16, #tpu.memory_space<vmem>>, vector<128x48xbf16>
    %c0_1 = arith.constant 0 : index
    %c0_2 = arith.constant 0 : index
    %1 = vector.load %arg2[%c0_1, %c0_2] : memref<48x128xbf16, #tpu.memory_space<vmem>>, vector<48x128xbf16>
    %cst = arith.constant dense<0.000000e+00> : vector<128x128xf32>
    %2 = tpu.matmul %0, %1, %cst {dimension_numbers = #tpu.dot_dimension_numbers<[1], [0], [0], [1], [0, 0, 1, 1], [], []>} : vector<128x48xbf16>, vector<48x128xbf16>, vector<128x128xf32> -> vector<128x128xf32>
    %c0_3 = arith.constant 0 : index
    %c0_4 = arith.constant 0 : index
    %3 = vector.load %arg3[%c0_3, %c0_4] : memref<1x128xf32, #tpu.memory_space<vmem>>, vector<1x128xf32>
    %4 = vector.broadcast %3 : vector<1x128xf32> to vector<128x128xf32>
    %5 = arith.addf %2, %4 : vector<128x128xf32>
    %cst_5 = arith.constant 0.000000e+00 : f32
    %6 = vector.broadcast %cst_5 : f32 to vector<128x128xf32>
    %7 = arith.maximumf %5, %6 : vector<128x128xf32>
    %8 = arith.truncf %7 : vector<128x128xf32> to vector<128x128xbf16>
    %c0_6 = arith.constant 0 : index
    %c0_7 = arith.constant 0 : index
    %9 = vector.load %arg6[%c0_6, %c0_7] : memref<128x128xbf16, #tpu.memory_space<vmem>>, vector<128x128xbf16>
    tpu.vector_store %arg6[%c0_6, %c0_7], %8 {strides = array<i32>} : memref<128x128xbf16, #tpu.memory_space<vmem>>, vector<128x128xbf16>,
    %10 = arith.truncf %7 : vector<128x128xf32> to vector<128x128xbf16>
    %c0_8 = arith.constant 0 : index
    %c0_9 = arith.constant 0 : index
    %11 = vector.load %arg4[%c0_8, %c0_9] : memref<128x1xbf16, #tpu.memory_space<vmem>>, vector<128x1xbf16>
    %cst_10 = arith.constant dense<0.000000e+00> : vector<128x1xf32>
    %12 = tpu.matmul %10, %11, %cst_10 {dimension_numbers = #tpu.dot_dimension_numbers<[1], [0], [0], [1], [0, 0, 1, 1], [], []>} : vector<128x128xbf16>, vector<128x1xbf16>, vector<128x1xf32> -> vector<128x1xf32>
    %c0_11 = arith.constant 0 : index
    %c0_12 = arith.constant 0 : index
    %13 = vector.load %arg5[%c0_11, %c0_12] : memref<1x1xf32, #tpu.memory_space<vmem>>, vector<1x1xf32>
    %14 = vector.broadcast %13 : vector<1x1xf32> to vector<128x1xf32>
    %15 = arith.addf %12, %14 : vector<128x1xf32>
    %c0_13 = arith.constant 0 : index
    %c0_14 = arith.constant 0 : index
    %16 = vector.load %arg7[%c0_13, %c0_14] : memref<128x1xf32, #tpu.memory_space<vmem>>, vector<128x1xf32>
    tpu.vector_store %arg7[%c0_13, %c0_14], %15 {strides = array<i32>} : memref<128x1xf32, #tpu.memory_space<vmem>>, vector<128x1xf32>,
    return
  }
  func.func @transform_0(%arg0: i32) -> (i32, i32) {
    %c0_i32 = arith.constant 0 : i32
    %c0_i32_0 = arith.constant 0 : i32
    return %arg0, %c0_i32 : i32, i32
  }
  func.func @transform_1(%arg0: i32) -> (i32, i32) {
    %c0_i32 = arith.constant 0 : i32
    %c0_i32_0 = arith.constant 0 : i32
    %c0_i32_1 = arith.constant 0 : i32
    return %c0_i32, %c0_i32_0 : i32, i32
  }
  func.func @transform_2(%arg0: i32) -> (i32, i32) {
    %c0_i32 = arith.constant 0 : i32
    %c0_i32_0 = arith.constant 0 : i32
    %c0_i32_1 = arith.constant 0 : i32
    return %c0_i32, %c0_i32_0 : i32, i32
  }
  func.func @transform_3(%arg0: i32) -> (i32, i32) {
    %c0_i32 = arith.constant 0 : i32
    %c0_i32_0 = arith.constant 0 : i32
    %c0_i32_1 = arith.constant 0 : i32
    return %c0_i32, %c0_i32_0 : i32, i32
  }
  func.func @transform_4(%arg0: i32) -> (i32, i32) {
    %c0_i32 = arith.constant 0 : i32
    %c0_i32_0 = arith.constant 0 : i32
    %c0_i32_1 = arith.constant 0 : i32
    return %c0_i32, %c0_i32_0 : i32, i32
  }
  func.func @transform_5(%arg0: i32) -> (i32, i32) {
    %c0_i32 = arith.constant 0 : i32
    %c0_i32_0 = arith.constant 0 : i32
    return %arg0, %c0_i32 : i32, i32
  }
  func.func @transform_6(%arg0: i32) -> (i32, i32) {
    %c0_i32 = arith.constant 0 : i32
    %c0_i32_0 = arith.constant 0 : i32
    return %arg0, %c0_i32 : i32, i32
  }
}

</mosaic_0001>

<bundles_post_ra>
// kernel: tpu_custom_call.1
= control target key start
LH: loop header
LB: loop body
LE: loop exit
PB: predicated region body
PF: predicated region fallthrough
CT: control target
= control target key end

     0   :  { %s972_s0 = inlined_call_operand.vmem [shape: bf16[128,48], index: 0, kind: input, shape index: {}]   ;;  %s973_s1 = inlined_call_operand.vmem [shape: bf16[48,128], index: 1, kind: input, shape index: {}]   ;;  %s974_s2 = inlined_call_operand.vmem [shape: f32[1,128], index: 2, kind: input, shape index: {}]   ;;  %s975_s3 = inlined_call_operand.vmem [shape: bf16[128,1], index: 3, kind: input, shape index: {}]   ;;  %s976_s4 = inlined_call_operand.<no memory space> [shape: f32[1,1], index: 4, kind: input, shape index: {}]   ;;  %s977_s5 = inlined_call_operand.hbm [shape: bf16[128,128], index: 5, kind: output, shape index: {0}]   ;;  %s978_s6 = inlined_call_operand.vmem [shape: f32[128,1], index: 6, kind: output, shape index: {1}]  }
   0x1   :  { %v12_v0 = vstv %s976_s4 }
   0x2   :  { %13 = vst [vmem:[#allocation2] sm:$0x1] %v12_v0 }
   0x3   :  { %v744_v1 = vld [vmem:[%s973_s1] sm:$0xff]   ;;  %v745_v2 = vld [vmem:[%s973_s1 + $0x8] sm:$0xff]   ;;  %vm113_vm0 = vcmask 392192   ;;  %v746_v4 = vld [vmem:[%s973_s1 + $0x10] sm:$0xff]  }
   0x4   :  { %671 = vmatprep.subr.bf16.mxu0 %v744_v1  ;;  %v747_v3 = vld [vmem:[%s972_s0] sm:$0xff]   ;;  %v748_v5 = vld [vmem:[%s972_s0 + $0x8] sm:$0xff]   ;;  %v749_v6 = vld [vmem:[%s972_s0 + $0x10] sm:$0xff]  }
   0x5   :  { %672 = vmatpush3.bf16.msra.mxu0 %v744_v1  ;;  %677 = vmatprep.mubr.msk.bf16.mxu0 %vm113_vm0, %v747_v3  ;;  %v755_v7 = vld [vmem:[%s975_s3] sm:$0xff]   ;;  %v756_v8 = vld [vmem:[%s975_s3 + $0x8] sm:$0xff]   ;;  %v757_v9 = vld [vmem:[%s975_s3 + $0x10] sm:$0xff]  }
   0x6   :  { %673 = vmatprep.subr.bf16.mxu0 %v745_v2  ;;  %725 = vmatprep.subr.bf16.mxu1 %v755_v7  ;;  %v750_v10 = vld [vmem:[%s972_s0 + $0x18] sm:$0xff]  }
   0x7   :  { %733 = vmatpush3.bf16.msra.mxu1 %v755_v7 }
   0x8   :  { %726 = vmatprep.subr.bf16.mxu1 %v756_v8 }
   0x9   :  { %674 = vmatpush3.bf16.msra.mxu0 %v745_v2 }
   0xa   :  { %675 = vmatprep.subr.bf16.mxu0 %v746_v4 }
   0xb   :  { %734 = vmatpush3.bf16.msra.mxu1 %v756_v8 }
   0xd   :  { %676 = vmatpush3.bf16.msra.mxu0 %v746_v4 }
   0xe   :  { %693 = vmatprep.subr.bf16.mxu0 %v755_v7 }
  0x10   :  { %678 = vmatmul.mubr.msk.bf16.vlgmr.msra.gmra.mrb[0].mxu0 %vm113_vm0, %v748_v5 }
  0x11   :  { %681 = vmatprep.mubr.msk.bf16.mxu0 %vm113_vm0, %v749_v6  ;;  %694 = vmatpush3.bf16.msra.mxu0 %v755_v7 }
  0x12   :  { %695 = vmatprep.subr.bf16.mxu0 %v756_v8 }
  0x13   :  { %14 = vsyncpa [#allocation4], 0  ;;  %v751_v11 = vld [vmem:[%s972_s0 + $0x20] sm:$0xff]   ;;  %727 = vmatprep.subr.bf16.mxu1 %v757_v9  ;;  %v758_v12 = vld [vmem:[%s975_s3 + $0x18] sm:$0xff]  }
  0x14   :  { %735 = vmatpush3.bf16.msra.mxu1 %v757_v9  ;;  %v759_v13 = vld [vmem:[%s975_s3 + $0x20] sm:$0xff]   ;;  %v752_v14 = vld [vmem:[%s972_s0 + $0x28] sm:$0xff]   ;;  %v753_v15 = vld [vmem:[%s972_s0 + $0x30] sm:$0xff]  }
  0x15   :  { %696 = vmatpush3.bf16.msra.mxu0 %v756_v8  ;;  %728 = vmatprep.subr.bf16.mxu1 %v758_v12  ;;  %v760_v16 = vld [vmem:[%s975_s3 + $0x28] sm:$0xff]   ;;  %v754_v17 = vld [vmem:[%s972_s0 + $0x38] sm:$0xff]   ;;  %v761_v18 = vld [vmem:[%s975_s3 + $0x30] sm:$0xff]  }
  0x16   :  { %697 = vmatprep.subr.bf16.mxu0 %v757_v9  ;;  %v762_v19 = vld [vmem:[%s975_s3 + $0x38] sm:$0xff]   ;;  %v536_v20 = vld [vmem:[%s974_s2] ss:$0 sm:$0xff]  ;;  %s787_s2 = smov [#allocation3]  }
  0x17   :  { %s521_s3 = sshll.u32 %s787_s2, 4  ;;  %s522_s3 = int_to_ptr.vmem [resolvable:$true] %s521_s3 }
  0x18   :  { %682 = vmatmul.mubr.msk.bf16.gmra.mrb[4].mxu0 %vm113_vm0, %v750_v10  ;;  %736 = vmatpush3.bf16.msra.mxu1 %v758_v12  ;;  %s763_s11 = scalar_lea.vmem %s522_s3, 1024  ;;  %p768_p1 = scmp.lt.s32.totalorder %s522_s3, %s522_s3 }
  0x19   :  { %685 = vmatprep.mubr.msk.bf16.mxu0 %vm113_vm0, %v751_v11  ;;  %698 = vmatpush3.bf16.msra.mxu0 %v757_v9  ;;  %p764_p0 = scmp.ne.s32.totalorder %s522_s3, %s763_s11  ;;  %p769_p2 = scmp.lt.s32.totalorder %s763_s11, %s763_s11 }
  0x1a   :  { %699 = vmatprep.subr.bf16.mxu0 %v758_v12  ;;  %729 = vmatprep.subr.bf16.mxu1 %v759_v13 }
  0x1b   :  { %p770_p3 = por %p769_p2, %p768_p1 }
  0x1c   :  { %737 = vmatpush3.bf16.msra.mxu1 %v759_v13 }
  0x1d   :  { %700 = vmatpush3.bf16.msra.mxu0 %v758_v12  ;;  %730 = vmatprep.subr.bf16.mxu1 %v760_v16  ;;  %p771_p4 = pnand %p770_p3, %p764_p0 }
  0x1e   :  { %701 = vmatprep.subr.bf16.mxu0 %v759_v13 }
  0x20   :  { %686 = vmatmul.mubr.msk.bf16.gmra.mrb[8].mxu0 %vm113_vm0, %v752_v14  ;;  %738 = vmatpush3.bf16.msra.mxu1 %v760_v16 }
  0x21   :  { %689 = vmatprep.mubr.msk.bf16.mxu0 %vm113_vm0, %v753_v15  ;;  %702 = vmatpush3.bf16.msra.mxu0 %v759_v13 }
  0x22   :  { %703 = vmatprep.subr.bf16.mxu0 %v760_v16  ;;  %731 = vmatprep.subr.bf16.mxu1 %v761_v18 }
  0x24   :  { %739 = vmatpush3.bf16.msra.mxu1 %v761_v18 }
  0x25   :  { %704 = vmatpush3.bf16.msra.mxu0 %v760_v16  ;;  %732 = vmatprep.subr.bf16.mxu1 %v762_v19 }
  0x26   :  { %705 = vmatprep.subr.bf16.mxu0 %v761_v18 }
  0x28   :  { %690 = vmatmul.mubr.msk.bf16.gmra.mrb[12].mxu0 %vm113_vm0, %v754_v17  ;;  %740 = vmatpush3.bf16.msra.mxu1 %v762_v19 }
  0x29   :  { %706 = vmatpush3.bf16.msra.mxu0 %v761_v18 }
  0x2a   :  { %707 = vmatprep.subr.bf16.mxu0 %v762_v19 }
  0x2d   :  { %708 = vmatpush3.bf16.msra.mxu0 %v762_v19 }
  0xe3   :  { %v679_v21 = vpop.f32.mrb[0].mxu0 }
  0xe4   :  { %v181_v22 = vadd.f32 %v679_v21, %v536_v20  ;;  %v172_v23 = vpop.f32.mrb[1].mxu0 }
  0xe5   :  { %v173_v24 = vadd.f32 %v536_v20, %v172_v23  ;;  %v680_v25 = vpop.f32.mrb[2].mxu0 }
  0xe6   :  { %v184_v26 = vadd.f32 %v680_v25, %v536_v20  ;;  %v175_v27 = vpop.f32.mrb[3].mxu0  ;;  %v237_v29 = vmax.f32 %v181_v22, 0.0 }
  0xe7   :  { %v176_v28 = vadd.f32 %v536_v20, %v175_v27  ;;  %v235_v31 = vmax.f32 %v173_v24, 0.0 }
  0xe8   :  { %v238_v30 = vmax.f32 %v184_v26, 0.0 }
  0xe9   :  { %v236_v32 = vmax.f32 %v176_v28, 0.0 }
  0xea   :  { %v252_v33 = vpack.c.bf16 %v238_v30, %v237_v29 }
  0xeb   :  { %v251_v34 = vpack.c.bf16 %v236_v32, %v235_v31  ;;  %v683_v35 = vpop.f32.mrb[4].mxu0 }
  0xec   :  { %637 = vst [vmem:[#allocation3 + $0x8] sm:$0xff] %v252_v33   ;;  %v197_v36 = vadd.f32 %v683_v35, %v536_v20  ;;  %v188_v37 = vpop.f32.mrb[5].mxu0 }
  0xed   :  { %601 = vst [vmem:[#allocation3] sm:$0xff] %v251_v34   ;;  %v189_v38 = vadd.f32 %v536_v20, %v188_v37  ;;  %v684_v39 = vpop.f32.mrb[6].mxu0  ;;  %709 = vmatprep.mubr.bf16.mxu0 %v251_v34 }
  0xee   :  { %v200_v40 = vadd.f32 %v684_v39, %v536_v20  ;;  %v191_v41 = vpop.f32.mrb[7].mxu0  ;;  %710 = vmatmul.mubr.bf16.vlgmr.msra.gmra.mrb[16].mxu0 %v252_v33  ;;  %v241_v43 = vmax.f32 %v197_v36, 0.0 }
  0xef   :  { %v192_v42 = vadd.f32 %v536_v20, %v191_v41  ;;  %v239_v45 = vmax.f32 %v189_v38, 0.0 }
  0xf0   :  { %v242_v44 = vmax.f32 %v200_v40, 0.0 }
  0xf1   :  { %v240_v46 = vmax.f32 %v192_v42, 0.0 }
  0xf2   :  { %v254_v47 = vpack.c.bf16 %v242_v44, %v241_v43 }
  0xf3   :  { %v687_v48 = vpop.f32.mrb[8].mxu0  ;;  %v253_v49 = vpack.c.bf16 %v240_v46, %v239_v45 }
  0xf4   :  { %639 = vst [vmem:[#allocation3 + $0x18] sm:$0xff] %v254_v47   ;;  %v213_v50 = vadd.f32 %v687_v48, %v536_v20  ;;  %v204_v51 = vpop.f32.mrb[9].mxu0 }
  0xf5   :  { %v205_v52 = vadd.f32 %v536_v20, %v204_v51  ;;  %v688_v53 = vpop.f32.mrb[10].mxu0  ;;  %638 = vst [vmem:[#allocation3 + $0x10] sm:$0xff] %v253_v49   ;;  %713 = vmatprep.mubr.bf16.mxu1 %v253_v49 }
  0xf6   :  { %v216_v54 = vadd.f32 %v688_v53, %v536_v20  ;;  %v207_v55 = vpop.f32.mrb[11].mxu0  ;;  %714 = vmatmul.mubr.bf16.vlgmr.msra.gmra.mrb[0].mxu1 %v254_v47  ;;  %v245_v57 = vmax.f32 %v213_v50, 0.0 }
  0xf7   :  { %v208_v56 = vadd.f32 %v536_v20, %v207_v55  ;;  %v243_v59 = vmax.f32 %v205_v52, 0.0 }
  0xf8   :  { %v246_v58 = vmax.f32 %v216_v54, 0.0 }
  0xf9   :  { %v244_v60 = vmax.f32 %v208_v56, 0.0 }
  0xfa   :  { %v256_v61 = vpack.c.bf16 %v246_v58, %v245_v57 }
  0xfb   :  { %v255_v62 = vpack.c.bf16 %v244_v60, %v243_v59  ;;  %v691_v63 = vpop.f32.mrb[12].mxu0 }
  0xfc   :  { %641 = vst [vmem:[#allocation3 + $0x28] sm:$0xff] %v256_v61   ;;  %v229_v0 = vadd.f32 %v691_v63, %v536_v20  ;;  %v220_v1 = vpop.f32.mrb[13].mxu0 }
  0xfd   :  { %640 = vst [vmem:[#allocation3 + $0x20] sm:$0xff] %v255_v62   ;;  %v221_v2 = vadd.f32 %v536_v20, %v220_v1  ;;  %v692_v3 = vpop.f32.mrb[14].mxu0  ;;  %717 = vmatprep.mubr.bf16.mxu1 %v255_v62 }
  0xfe   :  { %v232_v4 = vadd.f32 %v692_v3, %v536_v20  ;;  %v223_v5 = vpop.f32.mrb[15].mxu0  ;;  %718 = vmatmul.mubr.bf16.gmra.mrb[4].mxu1 %v256_v61  ;;  %v249_v7 = vmax.f32 %v229_v0, 0.0 }
  0xff   :  { %v224_v6 = vadd.f32 %v536_v20, %v223_v5  ;;  %v247_v9 = vmax.f32 %v221_v2, 0.0 }
 0x100   :  { %v250_v8 = vmax.f32 %v232_v4, 0.0 }
 0x101   :  { %v248_v10 = vmax.f32 %v224_v6, 0.0 }
 0x102   :  { %v258_v11 = vpack.c.bf16 %v250_v8, %v249_v7 }
 0x103   :  { %v257_v12 = vpack.c.bf16 %v248_v10, %v247_v9 }
 0x104   :  { %643 = vst [vmem:[#allocation3 + $0x38] sm:$0xff] %v258_v11  }
 0x105   :  { %642 = vst [vmem:[#allocation3 + $0x30] sm:$0xff] %v257_v12   ;;  %721 = vmatprep.mubr.bf16.mxu1 %v257_v12 }
 0x106   :  { %722 = vmatmul.mubr.bf16.gmra.mrb[8].mxu1 %v258_v11 }
 0x107   :  { %774 = shalt.err (!%p771_p4)
}
 0x108   :  { %s775_s1 = scalar_lea.hbm %s977_s5, 1024 }
 0x109   :  { %p776_p5 = scmp.ne.s32.totalorder %s977_s5, %s775_s1  ;;  %p779_p6 = scmp.lt.u32.totalorder %s775_s1, %s977_s5 }
 0x10b   :  { %p781_p7 = pnand %p779_p6, %p776_p5 }
 0x10d   :  { %784 = shalt.err (!%p781_p7)
}
 0x10e   :  { %s788_s18 = smov 64   ;;  %s789_s19 = smov 4   ;;  %v572_v13 = vld [vmem:[#allocation2] ss:$0 sm:$0xff]  ;;  %vm499_vm1 = vcmask 7168  }
 0x10f   :  { %527 = dma.vmem_to_hbm [thread:$0]  %s522_s3, 1024, %s977_s5, [#allocation4], %s788_s18, %s788_s18, %s789_s19  }
 0x1c1   :  { %v711_v14 = vpop.f32.mrb[16].mxu0 }
 0x1c2   :  { %v445_v15 = vadd.f32 %v711_v14, %v572_v13  ;;  %v436_v16 = vpop.f32.mrb[17].mxu0 }
 0x1c3   :  { %v437_v17 = vadd.f32 %v572_v13, %v436_v16  ;;  %v712_v18 = vpop.f32.mrb[18].mxu0 }
 0x1c4   :  { %502 = vst.msk [vmem:[%s978_s6 + $0x10] sm:$0xff] %vm499_vm1, %v445_v15  ;;  %v448_v19 = vadd.f32 %v712_v18, %v572_v13  ;;  %v439_v20 = vpop.f32.mrb[19].mxu0 }
 0x1c5   :  { %500 = vst.msk [vmem:[%s978_s6] sm:$0xff] %vm499_vm1, %v437_v17  ;;  %v440_v21 = vadd.f32 %v572_v13, %v439_v20 }
 0x1c6   :  { %503 = vst.msk [vmem:[%s978_s6 + $0x18] sm:$0xff] %vm499_vm1, %v448_v19 }
 0x1c7   :  { %501 = vst.msk [vmem:[%s978_s6 + $0x8] sm:$0xff] %vm499_vm1, %v440_v21 }
 0x1c9   :  { %v715_v22 = vpop.f32.mrb[0].mxu1 }
 0x1ca   :  { %v461_v23 = vadd.f32 %v715_v22, %v572_v13  ;;  %v452_v24 = vpop.f32.mrb[1].mxu1 }
 0x1cb   :  { %v453_v25 = vadd.f32 %v572_v13, %v452_v24  ;;  %v716_v26 = vpop.f32.mrb[2].mxu1 }
 0x1cc   :  { %506 = vst.msk [vmem:[%s978_s6 + $0x30] sm:$0xff] %vm499_vm1, %v461_v23  ;;  %v464_v27 = vadd.f32 %v716_v26, %v572_v13  ;;  %v455_v28 = vpop.f32.mrb[3].mxu1 }
 0x1cd   :  { %504 = vst.msk [vmem:[%s978_s6 + $0x20] sm:$0xff] %vm499_vm1, %v453_v25  ;;  %v456_v29 = vadd.f32 %v572_v13, %v455_v28 }
 0x1ce   :  { %507 = vst.msk [vmem:[%s978_s6 + $0x38] sm:$0xff] %vm499_vm1, %v464_v27 }
 0x1cf   :  { %505 = vst.msk [vmem:[%s978_s6 + $0x28] sm:$0xff] %vm499_vm1, %v456_v29 }
 0x1d1   :  { %v719_v30 = vpop.f32.mrb[4].mxu1 }
 0x1d2   :  { %v477_v31 = vadd.f32 %v719_v30, %v572_v13  ;;  %v468_v32 = vpop.f32.mrb[5].mxu1 }
 0x1d3   :  { %v469_v33 = vadd.f32 %v572_v13, %v468_v32  ;;  %v720_v34 = vpop.f32.mrb[6].mxu1 }
 0x1d4   :  { %510 = vst.msk [vmem:[%s978_s6 + $0x50] sm:$0xff] %vm499_vm1, %v477_v31  ;;  %v480_v35 = vadd.f32 %v720_v34, %v572_v13  ;;  %v471_v36 = vpop.f32.mrb[7].mxu1 }
 0x1d5   :  { %508 = vst.msk [vmem:[%s978_s6 + $0x40] sm:$0xff] %vm499_vm1, %v469_v33  ;;  %v472_v37 = vadd.f32 %v572_v13, %v471_v36 }
 0x1d6   :  { %511 = vst.msk [vmem:[%s978_s6 + $0x58] sm:$0xff] %vm499_vm1, %v480_v35 }
 0x1d7   :  { %509 = vst.msk [vmem:[%s978_s6 + $0x48] sm:$0xff] %vm499_vm1, %v472_v37 }
 0x1d9   :  { %v723_v38 = vpop.f32.mrb[8].mxu1 }
 0x1da   :  { %v493_v39 = vadd.f32 %v723_v38, %v572_v13  ;;  %v484_v40 = vpop.f32.mrb[9].mxu1 }
 0x1db   :  { %v485_v41 = vadd.f32 %v572_v13, %v484_v40  ;;  %v724_v42 = vpop.f32.mrb[10].mxu1 }
 0x1dc   :  { %514 = vst.msk [vmem:[%s978_s6 + $0x70] sm:$0xff] %vm499_vm1, %v493_v39  ;;  %v496_v43 = vadd.f32 %v724_v42, %v572_v13  ;;  %v487_v44 = vpop.f32.mrb[11].mxu1 }
 0x1dd   :  { %512 = vst.msk [vmem:[%s978_s6 + $0x60] sm:$0xff] %vm499_vm1, %v485_v41  ;;  %v488_v45 = vadd.f32 %v572_v13, %v487_v44 }
 0x1de   :  { %515 = vst.msk [vmem:[%s978_s6 + $0x78] sm:$0xff] %vm499_vm1, %v496_v43 }
 0x1df   :  { %513 = vst.msk [vmem:[%s978_s6 + $0x68] sm:$0xff] %vm499_vm1, %v488_v45 }
 0x1e0   :  { %785 = dma.done.wait [#allocation4], 1024  }
 0x1e1   :  { %786 = vsyncadd [#allocation4], 4294966272 }
 0x1e2   :  { %535 = vsyncpa [#allocation4], 1 }

</bundles_post_ra>
